<compile_context>
chip_gen: v5e
topology: v5e:2x2
jax: 0.10.0
libtpu: 0.0.40
codegen_flags: <defaults>
</compile_context>

<pallas_src>
import functools
import math

import numpy as np
import jax
import jax.numpy as jnp
from jax import lax
from jax.experimental import pallas as pl
from jax.experimental.pallas import tpu as pltpu


LN_EPS = 1e-12  # BERT-style custom LayerNorm eps (matches the reference LayerNorm)


def _default_vmem_limit():
    """Per-generation scoped-VMEM budget: ~80% of physical, capped at 110 MiB."""
    cap = 64 * 1024 * 1024
    try:
        info = pltpu.get_tpu_info()
        cap = int(getattr(info, "vmem_capacity_bytes", cap) or cap)
    except Exception:
        pass
    return max(32 * 1024 * 1024, min(int(cap * 0.8), 110 * 1024 * 1024))


VMEM_LIMIT_BYTES = _default_vmem_limit()


def _round_up(x, m):
    return ((x + m - 1) // m) * m


def _row_tile(m, preferred, align=16):
    """Row (M) tile: <= preferred, 16-aligned for bf16 sublane packing."""
    return min(preferred, _round_up(m, align))


def _pad_rows(x, tm):
    pad = (-x.shape[0]) % tm
    if pad:
        x = jnp.pad(x, ((0, pad), (0, 0)))
    return x


def _tile(dim, preferred, align):
    """Largest tile <= preferred that is a multiple of `align` and divides dim.
    Fails loudly instead of silently allocating a full-dimension block."""
    if dim <= preferred:
        return dim
    t = (preferred // align) * align
    while t >= align:
        if dim % t == 0:
            return t
        t -= align
    raise ValueError(
        f"no {align}-aligned tile <= {preferred} divides {dim}; pad this dimension")


# --------------------- fused Q|K|V projection (tiled matmul) ---------------------

def _matmul_bias_kernel(x_ref, w_ref, b_ref, o_ref, acc_ref):
    @pl.when(pl.program_id(2) == 0)
    def _():
        acc_ref[...] = jnp.zeros_like(acc_ref)

    acc_ref[...] += jnp.dot(x_ref[...], w_ref[...],
                            preferred_element_type=jnp.float32)

    @pl.when(pl.program_id(2) == pl.num_programs(2) - 1)
    def _():
        o_ref[...] = (acc_ref[...] + b_ref[...]).astype(o_ref.dtype)


def pallas_matmul_bias(x, w, b):
    """y = x @ w + b.  x: (M, K) bf16, w: (K, N) bf16, b: (1, N) f32 -> (M, N) bf16."""
    M, K = x.shape
    N = w.shape[1]
    tm = _row_tile(M, 512)
    tn = _tile(N, 512, 128)
    tk = _tile(K, 512, 128)
    xp = _pad_rows(x, tm)
    Mp = xp.shape[0]
    out = pl.pallas_call(
        _matmul_bias_kernel,
        out_shape=jax.ShapeDtypeStruct((Mp, N), jnp.bfloat16),
        grid=(Mp // tm, N // tn, K // tk),
        in_specs=[
            pl.BlockSpec((tm, tk), lambda i, j, k: (i, k)),
            pl.BlockSpec((tk, tn), lambda i, j, k: (k, j)),
            pl.BlockSpec((1, tn), lambda i, j, k: (0, j)),
        ],
        out_specs=pl.BlockSpec((tm, tn), lambda i, j, k: (i, j)),
        scratch_shapes=[pltpu.VMEM((tm, tn), jnp.float32)],
        compiler_params=pltpu.CompilerParams(
            dimension_semantics=("parallel", "parallel", "arbitrary"),
            vmem_limit_bytes=VMEM_LIMIT_BYTES),
    )(xp, w, b)
    return out[:M] if Mp != M else out


# ------------------------------- attention ---------------------------------

def _attention_kernel(qkv_ref, m_ref, o_ref, *, n_head, d_head):
    # qkv_ref: (S, 3*D) bf16 fused q|k|v for one batch (q already carries 1/sqrt(Dh))
    # m_ref  : (1, S) f32 additive mask bias broadcast over query rows
    D = n_head * d_head
    qkv = qkv_ref[...]
    m = m_ref[...]
    outs = []
    for h in range(n_head):
        lo = h * d_head
        qh = qkv[:, lo:lo + d_head]
        kh = qkv[:, D + lo:D + lo + d_head]
        vh = qkv[:, 2 * D + lo:2 * D + lo + d_head]
        # q @ k^T without materializing a transpose (contract last dims of both).
        s = lax.dot_general(qh, kh, (((1,), (1,)), ((), ())),
                            preferred_element_type=jnp.float32)        # (S, S) f32
        s = s + m
        s = s - jnp.max(s, axis=-1, keepdims=True)
        p = jnp.exp(s)
        p = p * pl.reciprocal(jnp.sum(p, axis=-1, keepdims=True), approx=True)
        outs.append(jnp.dot(p.astype(jnp.bfloat16), vh,
                            preferred_element_type=jnp.float32))
    # single lane-dense (S, D) store, bf16 out
    o_ref[...] = jnp.concatenate(outs, axis=-1).astype(o_ref.dtype)


def pallas_attention(qkv, mask_bias, n_head):
    # qkv: (B, S, 3D) bf16; mask_bias: (B, 1, S) f32 -> (B, S, D) bf16
    B, S, D3 = qkv.shape
    D = D3 // 3
    d_head = D // n_head
    kernel = functools.partial(_attention_kernel, n_head=n_head, d_head=d_head)
    return pl.pallas_call(
        kernel,
        out_shape=jax.ShapeDtypeStruct((B, S, D), jnp.bfloat16),
        grid=(B,),
        in_specs=[
            pl.BlockSpec((None, S, D3), lambda b: (b, 0, 0)),
            pl.BlockSpec((None, 1, S), lambda b: (b, 0, 0)),
        ],
        out_specs=pl.BlockSpec((None, S, D), lambda b: (b, 0, 0)),
        compiler_params=pltpu.CompilerParams(
            dimension_semantics=("parallel",),
            vmem_limit_bytes=VMEM_LIMIT_BYTES),
    )(qkv, mask_bias)


# ---------------- out-projection + residual + LayerNorm (fused, K-tiled) ----------------

def _proj_add_ln_kernel(a_ref, r_ref, w_ref, b_ref, g_ref, bb_ref, o_ref, acc_ref,
                        *, eps):
    k = pl.program_id(1)

    @pl.when(k == 0)
    def _():
        acc_ref[...] = jnp.zeros_like(acc_ref)

    acc_ref[...] += jnp.dot(a_ref[...], w_ref[...],
                            preferred_element_type=jnp.float32)

    @pl.when(k == pl.num_programs(1) - 1)
    def _():
        x = acc_ref[...] + b_ref[...] + r_ref[...].astype(jnp.float32)
        mean = jnp.mean(x, axis=-1, keepdims=True)
        var = jnp.mean((x - mean) ** 2, axis=-1, keepdims=True)   # biased variance
        xn = (x - mean) * lax.rsqrt(var + eps)
        o_ref[...] = (xn * g_ref[...] + bb_ref[...]).astype(o_ref.dtype)


def pallas_proj_add_layernorm(a, residual, w, b, gamma, beta, eps=LN_EPS):
    """(a @ w + b + residual) -> LayerNorm.  a/residual bf16, w bf16 -> bf16."""
    M, K = a.shape
    D = w.shape[1]
    tm = _row_tile(M, 256)
    tk = _tile(K, 512, 128)
    ap = _pad_rows(a, tm)
    rp = _pad_rows(residual, tm)
    Mp = ap.shape[0]
    kernel = functools.partial(_proj_add_ln_kernel, eps=eps)
    out = pl.pallas_call(
        kernel,
        out_shape=jax.ShapeDtypeStruct((Mp, D), jnp.bfloat16),
        grid=(Mp // tm, K // tk),
        in_specs=[
            pl.BlockSpec((tm, tk), lambda i, k: (i, k)),
            pl.BlockSpec((tm, D), lambda i, k: (i, 0)),
            pl.BlockSpec((tk, D), lambda i, k: (k, 0)),
            pl.BlockSpec((1, D), lambda i, k: (0, 0)),
            pl.BlockSpec((1, D), lambda i, k: (0, 0)),
            pl.BlockSpec((1, D), lambda i, k: (0, 0)),
        ],
        out_specs=pl.BlockSpec((tm, D), lambda i, k: (i, 0)),
        scratch_shapes=[pltpu.VMEM((tm, D), jnp.float32)],
        compiler_params=pltpu.CompilerParams(
            dimension_semantics=("parallel", "arbitrary"),
            vmem_limit_bytes=VMEM_LIMIT_BYTES),
    )(ap, rp, w, b, gamma, beta)
    return out[:M] if Mp != M else out


# --------- FFN (W1 -> ReLU -> W2) + residual + LayerNorm, H-tiled accumulator ---------

def _ffn_add_ln_kernel(x_ref, w1_ref, b1_ref, w2_ref, b2_ref, g_ref, bb_ref, o_ref,
                       acc_ref, *, eps):
    h_idx = pl.program_id(1)

    @pl.when(h_idx == 0)
    def _():
        acc_ref[...] = jnp.zeros_like(acc_ref)

    x = x_ref[...]                                                    # (tm, D) bf16
    h = jnp.dot(x, w1_ref[...], preferred_element_type=jnp.float32) + b1_ref[...]
    h = jnp.maximum(h, 0.0)                                           # ReLU per h-chunk
    acc_ref[...] += jnp.dot(h.astype(jnp.bfloat16), w2_ref[...],
                            preferred_element_type=jnp.float32)

    @pl.when(h_idx == pl.num_programs(1) - 1)
    def _():
        z = acc_ref[...] + b2_ref[...] + x_ref[...].astype(jnp.float32)  # bias + residual
        mean = jnp.mean(z, axis=-1, keepdims=True)
        var = jnp.mean((z - mean) ** 2, axis=-1, keepdims=True)
        zn = (z - mean) * lax.rsqrt(var + eps)
        o_ref[...] = (zn * g_ref[...] + bb_ref[...]).astype(o_ref.dtype)


def pallas_ffn_add_layernorm(x, w1, b1, w2, b2, gamma, beta, eps=LN_EPS):
    """LayerNorm(x + W2 @ relu(W1 @ x + b1) + b2), hidden dim tiled."""
    M, D = x.shape
    H = w1.shape[1]
    tm = _row_tile(M, 256)
    th = _tile(H, 512, 128)
    xp = _pad_rows(x, tm)
    Mp = xp.shape[0]
    kernel = functools.partial(_ffn_add_ln_kernel, eps=eps)
    out = pl.pallas_call(
        kernel,
        out_shape=jax.ShapeDtypeStruct((Mp, D), jnp.bfloat16),
        grid=(Mp // tm, H // th),
        in_specs=[
            pl.BlockSpec((tm, D), lambda i, h: (i, 0)),
            pl.BlockSpec((D, th), lambda i, h: (0, h)),
            pl.BlockSpec((1, th), lambda i, h: (0, h)),
            pl.BlockSpec((th, D), lambda i, h: (h, 0)),
            pl.BlockSpec((1, D), lambda i, h: (0, 0)),
            pl.BlockSpec((1, D), lambda i, h: (0, 0)),
            pl.BlockSpec((1, D), lambda i, h: (0, 0)),
        ],
        out_specs=pl.BlockSpec((tm, D), lambda i, h: (i, 0)),
        scratch_shapes=[pltpu.VMEM((tm, D), jnp.float32)],
        compiler_params=pltpu.CompilerParams(
            dimension_semantics=("parallel", "arbitrary"),
            vmem_limit_bytes=VMEM_LIMIT_BYTES),
    )(xp, w1, b1, w2, b2, gamma, beta)
    return out[:M] if Mp != M else out


# --------------------------- parameters & glue -----------------------------

def sinusoidal_pe(S, D):
    pos = np.arange(S, dtype=np.float32)[:, None]
    i = np.arange(0, D, 2, dtype=np.float32)[None, :]
    angle = pos / np.power(10000.0, i / D)
    pe = np.zeros((S, D), dtype=np.float32)
    pe[:, 0::2] = np.sin(angle)
    pe[:, 1::2] = np.cos(angle)
    return jnp.asarray(pe)


def init_params(key, n_layer, d_model, n_head, d_hidden, vocab_size):
    d_head = d_model // n_head
    scale = 1.0 / math.sqrt(d_head)
    keys = jax.random.split(key, 1 + n_layer)
    emb = jax.random.normal(keys[0], (vocab_size, d_model), jnp.float32) * 0.02

    def lin(kk, din, dout):
        # stored as (in, out); PyTorch nn.Linear weight (out, in) is its transpose
        w = jax.random.normal(kk, (din, dout), jnp.float32) * 0.02
        b = jnp.zeros((1, dout), jnp.float32)
        return w, b

    layers = []
    for l in range(n_layer):
        k = jax.random.split(keys[1 + l], 6)
        wq, bq = lin(k[0], d_model, d_model)
        wk, bk = lin(k[1], d_model, d_model)
        wv, bv = lin(k[2], d_model, d_model)
        wo, bo = lin(k[3], d_model, d_model)
        w1, b1 = lin(k[4], d_model, d_hidden)
        w2, b2 = lin(k[5], d_hidden, d_model)
        # Fold the 1/sqrt(d_head) attention scale into the Q projection (free),
        # fuse Q|K|V into a single (D, 3D) weight, store matmul weights in bf16.
        wqkv = jnp.concatenate([wq * scale, wk, wv], axis=1).astype(jnp.bfloat16)
        bqkv = jnp.concatenate([bq * scale, bk, bv], axis=1)
        ones = jnp.ones((1, d_model), jnp.float32)
        zeros = jnp.zeros((1, d_model), jnp.float32)
        layers.append(dict(
            wqkv=(wqkv, bqkv),
            wo=(wo.astype(jnp.bfloat16), bo),
            ln1=(ones, zeros),
            ffn1=(w1.astype(jnp.bfloat16), b1),
            ffn2=(w2.astype(jnp.bfloat16), b2),
            ln2=(ones, zeros),
        ))
    return dict(emb=emb, layers=layers)


@functools.partial(jax.jit, static_argnames=("n_head",))
def encoder_forward(params, tokens, mask, pe, n_head):
    B, S = tokens.shape
    D = params["emb"].shape[1]

    # TransformerEmbeddings: token embedding gather + (precomputed) sinusoidal PE.
    # Activation stream kept in bf16 between kernels; statistics stay f32 in-kernel.
    # TODO(synk): nn.Dropout omitted (eval-mode / drop_rate=0 identity).
    x = (jnp.take(params["emb"], tokens, axis=0) + pe[None, :, :]).astype(jnp.bfloat16)

    # additive attention mask bias, matching masked_fill(mask == 0, -10000)
    mask_bias = jnp.where(mask == 0, -10000.0, 0.0).astype(jnp.float32).reshape(B, 1, S)

    for lp in params["layers"]:
        residual = x.reshape(B * S, D)                                # bf16

        # ----- MultiHeadedAttention -----
        qkv = pallas_matmul_bias(residual, *lp["wqkv"])               # (B*S, 3D) bf16
        attn = pallas_attention(qkv.reshape(B, S, 3 * D), mask_bias, n_head)
        # out-projection + residual + norm1 fused in one kernel
        x2 = pallas_proj_add_layernorm(attn.reshape(B * S, D), residual,
                                       *lp["wo"], *lp["ln1"])

        # ----- PositionwiseFeedForward + residual + norm2 (fully fused, H-tiled) -----
        x2 = pallas_ffn_add_layernorm(x2, *lp["ffn1"], *lp["ffn2"], *lp["ln2"])

        x = x2.reshape(B, S, D)

    return x.astype(jnp.float32)


# --------------------------------- main ------------------------------------

if __name__ == "__main__":
    n_layer = 2
    d_model = 32
    n_head = 4
    d_hidden = 64
    vocab_size = 50
    B, S = 2, 8

    root = jax.random.PRNGKey(0)
    k_param, k_tok = jax.random.split(root)

    params = init_params(k_param, n_layer, d_model, n_head, d_hidden, vocab_size)

    tokens = jax.random.randint(k_tok, (B, S), 0, vocab_size, dtype=jnp.int32)
    mask = jnp.ones((B, S), dtype=jnp.int32)
    mask = mask.at[1, -2:].set(0)          # second sequence has 2 padded positions

    pe = sinusoidal_pe(S, d_model)         # hoisted out of the forward pass

    out = encoder_forward(params, tokens, mask, pe, n_head=n_head)
    out = jax.block_until_ready(out)

    assert out.shape == (B, S, d_model), out.shape
    assert jnp.all(jnp.isfinite(out))
    print("KERNEL_OK")
</pallas_src>

<mosaic_0001>
module attributes {stable_mosaic.version = 11 : i64} {
  func.func @_proj_add_ln_kernel(%arg0: i32, %arg1: i32, %arg2: memref<16x32xbf16, #tpu.memory_space<vmem>>, %arg3: memref<16x32xbf16, #tpu.memory_space<vmem>>, %arg4: memref<32x32xbf16, #tpu.memory_space<vmem>>, %arg5: memref<1x32xf32, #tpu.memory_space<vmem>>, %arg6: memref<1x32xf32, #tpu.memory_space<vmem>>, %arg7: memref<1x32xf32, #tpu.memory_space<vmem>>, %arg8: memref<16x32xbf16, #tpu.memory_space<vmem>>, %arg9: memref<16x32xf32, #tpu.memory_space<vmem>>) attributes {dimension_semantics = [#tpu.dimension_semantics<parallel>, #tpu.dimension_semantics<arbitrary>], iteration_bounds = array<i64: 1, 1>, scalar_prefetch = 0 : i64, scratch_operands = 1 : i64, tpu.core_type = #tpu.core_type<tc>, window_params = [{transform_indices = @transform_0, window_bounds = array<i64: 16, 32>}, {transform_indices = @transform_1, window_bounds = array<i64: 16, 32>}, {transform_indices = @transform_2, window_bounds = array<i64: 32, 32>}, {pipeline_mode = #tpu.pipeline_mode<synchronous>, transform_indices = @transform_3, window_bounds = array<i64: 1, 32>}, {pipeline_mode = #tpu.pipeline_mode<synchronous>, transform_indices = @transform_4, window_bounds = array<i64: 1, 32>}, {pipeline_mode = #tpu.pipeline_mode<synchronous>, transform_indices = @transform_5, window_bounds = array<i64: 1, 32>}, {transform_indices = @transform_6, window_bounds = array<i64: 16, 32>}]} {
    %c0_i32 = arith.constant 0 : i32
    %0 = arith.cmpi eq, %arg1, %c0_i32 : i32
    %1 = arith.extui %0 : i1 to i32
    %c0_i32_0 = arith.constant 0 : i32
    %2 = arith.cmpi ne, %1, %c0_i32_0 : i32
    scf.if %2 {
      %cst_10 = arith.constant 0.000000e+00 : f32
      %12 = vector.broadcast %cst_10 : f32 to vector<16x32xf32>
      %c0_11 = arith.constant 0 : index
      %c0_12 = arith.constant 0 : index
      %13 = vector.load %arg9[%c0_11, %c0_12] : memref<16x32xf32, #tpu.memory_space<vmem>>, vector<16x32xf32>
      tpu.vector_store %arg9[%c0_11, %c0_12], %12 {strides = array<i32>} : memref<16x32xf32, #tpu.memory_space<vmem>>, vector<16x32xf32>,
    } else {
    }
    %c0 = arith.constant 0 : index
    %c0_1 = arith.constant 0 : index
    %3 = vector.load %arg9[%c0, %c0_1] : memref<16x32xf32, #tpu.memory_space<vmem>>, vector<16x32xf32>
    %c0_2 = arith.constant 0 : index
    %c0_3 = arith.constant 0 : index
    %4 = vector.load %arg2[%c0_2, %c0_3] : memref<16x32xbf16, #tpu.memory_space<vmem>>, vector<16x32xbf16>
    %c0_4 = arith.constant 0 : index
    %c0_5 = arith.constant 0 : index
    %5 = vector.load %arg4[%c0_4, %c0_5] : memref<32x32xbf16, #tpu.memory_space<vmem>>, vector<32x32xbf16>
    %cst = arith.constant dense<0.000000e+00> : vector<16x32xf32>
    %6 = tpu.matmul %4, %5, %cst {dimension_numbers = #tpu.dot_dimension_numbers<[1], [0], [0], [1], [0, 0, 1, 1], [], []>} : vector<16x32xbf16>, vector<32x32xbf16>, vector<16x32xf32> -> vector<16x32xf32>
    %7 = arith.addf %3, %6 : vector<16x32xf32>
    %c0_6 = arith.constant 0 : index
    %c0_7 = arith.constant 0 : index
    %8 = vector.load %arg9[%c0_6, %c0_7] : memref<16x32xf32, #tpu.memory_space<vmem>>, vector<16x32xf32>
    tpu.vector_store %arg9[%c0_6, %c0_7], %7 {strides = array<i32>} : memref<16x32xf32, #tpu.memory_space<vmem>>, vector<16x32xf32>,
    %c0_i32_8 = arith.constant 0 : i32
    %9 = arith.cmpi eq, %arg1, %c0_i32_8 : i32
    %10 = arith.extui %9 : i1 to i32
    %c0_i32_9 = arith.constant 0 : i32
    %11 = arith.cmpi ne, %10, %c0_i32_9 : i32
    scf.if %11 {
      %c0_10 = arith.constant 0 : index
      %c0_11 = arith.constant 0 : index
      %12 = vector.load %arg9[%c0_10, %c0_11] : memref<16x32xf32, #tpu.memory_space<vmem>>, vector<16x32xf32>
      %c0_12 = arith.constant 0 : index
      %c0_13 = arith.constant 0 : index
      %13 = vector.load %arg5[%c0_12, %c0_13] : memref<1x32xf32, #tpu.memory_space<vmem>>, vector<1x32xf32>
      %14 = vector.broadcast %13 : vector<1x32xf32> to vector<16x32xf32>
      %15 = arith.addf %12, %14 : vector<16x32xf32>
      %c0_14 = arith.constant 0 : index
      %c0_15 = arith.constant 0 : index
      %16 = vector.load %arg3[%c0_14, %c0_15] : memref<16x32xbf16, #tpu.memory_space<vmem>>, vector<16x32xbf16>
      %17 = arith.extf %16 : vector<16x32xbf16> to vector<16x32xf32>
      %18 = arith.addf %15, %17 : vector<16x32xf32>
      %cst_16 = arith.constant dense<0.000000e+00> : vector<16xf32>
      %19 = vector.multi_reduction <add>, %18, %cst_16 [1] : vector<16x32xf32> to vector<16xf32>
      %20 = vector.shape_cast %19 : vector<16xf32> to vector<16x1xf32>
      %cst_17 = arith.constant 3.200000e+01 : f32
      %21 = vector.broadcast %cst_17 : f32 to vector<16x1xf32>
      %22 = arith.divf %20, %21 : vector<16x1xf32>
      %23 = vector.broadcast %22 : vector<16x1xf32> to vector<16x32xf32>
      %24 = arith.subf %18, %23 : vector<16x32xf32>
      %25 = arith.mulf %24, %24 : vector<16x32xf32>
      %cst_18 = arith.constant dense<0.000000e+00> : vector<16xf32>
      %26 = vector.multi_reduction <add>, %25, %cst_18 [1] : vector<16x32xf32> to vector<16xf32>
      %27 = vector.shape_cast %26 : vector<16xf32> to vector<16x1xf32>
      %cst_19 = arith.constant 3.200000e+01 : f32
      %28 = vector.broadcast %cst_19 : f32 to vector<16x1xf32>
      %29 = arith.divf %27, %28 : vector<16x1xf32>
      %30 = vector.broadcast %22 : vector<16x1xf32> to vector<16x32xf32>
      %31 = arith.subf %18, %30 : vector<16x32xf32>
      %cst_20 = arith.constant 9.99999996E-13 : f32
      %32 = vector.broadcast %cst_20 : f32 to vector<16x1xf32>
      %33 = arith.addf %29, %32 : vector<16x1xf32>
      %34 = math.rsqrt %33 : vector<16x1xf32>
      %35 = vector.broadcast %34 : vector<16x1xf32> to vector<16x32xf32>
      %36 = arith.mulf %31, %35 : vector<16x32xf32>
      %c0_21 = arith.constant 0 : index
      %c0_22 = arith.constant 0 : index
      %37 = vector.load %arg6[%c0_21, %c0_22] : memref<1x32xf32, #tpu.memory_space<vmem>>, vector<1x32xf32>
      %38 = vector.broadcast %37 : vector<1x32xf32> to vector<16x32xf32>
      %39 = arith.mulf %36, %38 : vector<16x32xf32>
      %c0_23 = arith.constant 0 : index
      %c0_24 = arith.constant 0 : index
      %40 = vector.load %arg7[%c0_23, %c0_24] : memref<1x32xf32, #tpu.memory_space<vmem>>, vector<1x32xf32>
      %41 = vector.broadcast %40 : vector<1x32xf32> to vector<16x32xf32>
      %42 = arith.addf %39, %41 : vector<16x32xf32>
      %43 = arith.truncf %42 : vector<16x32xf32> to vector<16x32xbf16>
      %c0_25 = arith.constant 0 : index
      %c0_26 = arith.constant 0 : index
      %44 = vector.load %arg8[%c0_25, %c0_26] : memref<16x32xbf16, #tpu.memory_space<vmem>>, vector<16x32xbf16>
      tpu.vector_store %arg8[%c0_25, %c0_26], %43 {strides = array<i32>} : memref<16x32xbf16, #tpu.memory_space<vmem>>, vector<16x32xbf16>,
    } else {
    }
    return
  }
  func.func @transform_0(%arg0: i32, %arg1: i32) -> (i32, i32) {
    %c0_i32 = arith.constant 0 : i32
    return %arg0, %arg1 : i32, i32
  }
  func.func @transform_1(%arg0: i32, %arg1: i32) -> (i32, i32) {
    %c0_i32 = arith.constant 0 : i32
    %c0_i32_0 = arith.constant 0 : i32
    return %arg0, %c0_i32 : i32, i32
  }
  func.func @transform_2(%arg0: i32, %arg1: i32) -> (i32, i32) {
    %c0_i32 = arith.constant 0 : i32
    %c0_i32_0 = arith.constant 0 : i32
    return %arg1, %c0_i32 : i32, i32
  }
  func.func @transform_3(%arg0: i32, %arg1: i32) -> (i32, i32) {
    %c0_i32 = arith.constant 0 : i32
    %c0_i32_0 = arith.constant 0 : i32
    %c0_i32_1 = arith.constant 0 : i32
    return %c0_i32, %c0_i32_0 : i32, i32
  }
  func.func @transform_4(%arg0: i32, %arg1: i32) -> (i32, i32) {
    %c0_i32 = arith.constant 0 : i32
    %c0_i32_0 = arith.constant 0 : i32
    %c0_i32_1 = arith.constant 0 : i32
    return %c0_i32, %c0_i32_0 : i32, i32
  }
  func.func @transform_5(%arg0: i32, %arg1: i32) -> (i32, i32) {
    %c0_i32 = arith.constant 0 : i32
    %c0_i32_0 = arith.constant 0 : i32
    %c0_i32_1 = arith.constant 0 : i32
    return %c0_i32, %c0_i32_0 : i32, i32
  }
  func.func @transform_6(%arg0: i32, %arg1: i32) -> (i32, i32) {
    %c0_i32 = arith.constant 0 : i32
    %c0_i32_0 = arith.constant 0 : i32
    return %arg0, %c0_i32 : i32, i32
  }
}

module attributes {stable_mosaic.version = 11 : i64} {
  func.func @_attention_kernel(%arg0: i32, %arg1: memref<1x8x96xbf16, #tpu.memory_space<vmem>>, %arg2: memref<1x1x8xf32, #tpu.memory_space<vmem>>, %arg3: memref<1x8x32xbf16, #tpu.memory_space<vmem>>) attributes {dimension_semantics = [#tpu.dimension_semantics<parallel>], iteration_bounds = array<i64: 2>, scalar_prefetch = 0 : i64, scratch_operands = 0 : i64, tpu.core_type = #tpu.core_type<tc>, window_params = [{transform_indices = @transform_0, window_bounds = array<i64: 1, 8, 96>}, {transform_indices = @transform_1, window_bounds = array<i64: 1, 1, 8>}, {transform_indices = @transform_2, window_bounds = array<i64: 1, 8, 32>}]} {
    %c0 = arith.constant 0 : index
    %c0_0 = arith.constant 0 : index
    %c0_1 = arith.constant 0 : index
    %0 = vector.load %arg1[%c0, %c0_0, %c0_1] : memref<1x8x96xbf16, #tpu.memory_space<vmem>>, vector<1x8x96xbf16>
    %1 = vector.shape_cast %0 : vector<1x8x96xbf16> to vector<8x96xbf16>
    %c0_2 = arith.constant 0 : index
    %c0_3 = arith.constant 0 : index
    %c0_4 = arith.constant 0 : index
    %2 = vector.load %arg2[%c0_2, %c0_3, %c0_4] : memref<1x1x8xf32, #tpu.memory_space<vmem>>, vector<1x1x8xf32>
    %3 = vector.shape_cast %2 : vector<1x1x8xf32> to vector<1x8xf32>
    %4 = vector.extract_strided_slice %1 {offsets = [0, 0], sizes = [8, 8], strides = [1, 1]} : vector<8x96xbf16> to vector<8x8xbf16>
    %5 = vector.extract_strided_slice %1 {offsets = [0, 32], sizes = [8, 8], strides = [1, 1]} : vector<8x96xbf16> to vector<8x8xbf16>
    %6 = vector.extract_strided_slice %1 {offsets = [0, 64], sizes = [8, 8], strides = [1, 1]} : vector<8x96xbf16> to vector<8x8xbf16>
    %cst = arith.constant dense<0.000000e+00> : vector<8x8xf32>
    %7 = tpu.matmul %4, %5, %cst {dimension_numbers = #tpu.dot_dimension_numbers<[1], [1], [0], [0], [0, 0, 1, 0], [], []>} : vector<8x8xbf16>, vector<8x8xbf16>, vector<8x8xf32> -> vector<8x8xf32>
    %8 = vector.broadcast %3 : vector<1x8xf32> to vector<8x8xf32>
    %9 = arith.addf %7, %8 : vector<8x8xf32>
    %cst_5 = arith.constant dense<0xFF800000> : vector<8xf32>
    %10 = vector.multi_reduction <maximumf>, %9, %cst_5 [1] : vector<8x8xf32> to vector<8xf32>
    %11 = vector.shape_cast %10 : vector<8xf32> to vector<8x1xf32>
    %12 = vector.broadcast %11 : vector<8x1xf32> to vector<8x8xf32>
    %13 = arith.subf %9, %12 : vector<8x8xf32>
    %14 = math.exp %13 : vector<8x8xf32>
    %cst_6 = arith.constant dense<0.000000e+00> : vector<8xf32>
    %15 = vector.multi_reduction <add>, %14, %cst_6 [1] : vector<8x8xf32> to vector<8xf32>
    %16 = vector.shape_cast %15 : vector<8xf32> to vector<8x1xf32>
    %17 = tpu.reciprocal %16 {approx = true} : vector<8x1xf32> -> vector<8x1xf32>
    %18 = vector.broadcast %17 : vector<8x1xf32> to vector<8x8xf32>
    %19 = arith.mulf %14, %18 : vector<8x8xf32>
    %20 = arith.truncf %19 : vector<8x8xf32> to vector<8x8xbf16>
    %cst_7 = arith.constant dense<0.000000e+00> : vector<8x8xf32>
    %21 = tpu.matmul %20, %6, %cst_7 {dimension_numbers = #tpu.dot_dimension_numbers<[1], [0], [0], [1], [0, 0, 1, 1], [], []>} : vector<8x8xbf16>, vector<8x8xbf16>, vector<8x8xf32> -> vector<8x8xf32>
    %22 = vector.extract_strided_slice %1 {offsets = [0, 8], sizes = [8, 8], strides = [1, 1]} : vector<8x96xbf16> to vector<8x8xbf16>
    %23 = vector.extract_strided_slice %1 {offsets = [0, 40], sizes = [8, 8], strides = [1, 1]} : vector<8x96xbf16> to vector<8x8xbf16>
    %24 = vector.extract_strided_slice %1 {offsets = [0, 72], sizes = [8, 8], strides = [1, 1]} : vector<8x96xbf16> to vector<8x8xbf16>
    %cst_8 = arith.constant dense<0.000000e+00> : vector<8x8xf32>
    %25 = tpu.matmul %22, %23, %cst_8 {dimension_numbers = #tpu.dot_dimension_numbers<[1], [1], [0], [0], [0, 0, 1, 0], [], []>} : vector<8x8xbf16>, vector<8x8xbf16>, vector<8x8xf32> -> vector<8x8xf32>
    %26 = vector.broadcast %3 : vector<1x8xf32> to vector<8x8xf32>
    %27 = arith.addf %25, %26 : vector<8x8xf32>
    %cst_9 = arith.constant dense<0xFF800000> : vector<8xf32>
    %28 = vector.multi_reduction <maximumf>, %27, %cst_9 [1] : vector<8x8xf32> to vector<8xf32>
    %29 = vector.shape_cast %28 : vector<8xf32> to vector<8x1xf32>
    %30 = vector.broadcast %29 : vector<8x1xf32> to vector<8x8xf32>
    %31 = arith.subf %27, %30 : vector<8x8xf32>
    %32 = math.exp %31 : vector<8x8xf32>
    %cst_10 = arith.constant dense<0.000000e+00> : vector<8xf32>
    %33 = vector.multi_reduction <add>, %32, %cst_10 [1] : vector<8x8xf32> to vector<8xf32>
    %34 = vector.shape_cast %33 : vector<8xf32> to vector<8x1xf32>
    %35 = tpu.reciprocal %34 {approx = true} : vector<8x1xf32> -> vector<8x1xf32>
    %36 = vector.broadcast %35 : vector<8x1xf32> to vector<8x8xf32>
    %37 = arith.mulf %32, %36 : vector<8x8xf32>
    %38 = arith.truncf %37 : vector<8x8xf32> to vector<8x8xbf16>
    %cst_11 = arith.constant dense<0.000000e+00> : vector<8x8xf32>
    %39 = tpu.matmul %38, %24, %cst_11 {dimension_numbers = #tpu.dot_dimension_numbers<[1], [0], [0], [1], [0, 0, 1, 1], [], []>} : vector<8x8xbf16>, vector<8x8xbf16>, vector<8x8xf32> -> vector<8x8xf32>
    %40 = vector.extract_strided_slice %1 {offsets = [0, 16], sizes = [8, 8], strides = [1, 1]} : vector<8x96xbf16> to vector<8x8xbf16>
    %41 = vector.extract_strided_slice %1 {offsets = [0, 48], sizes = [8, 8], strides = [1, 1]} : vector<8x96xbf16> to vector<8x8xbf16>
    %42 = vector.extract_strided_slice %1 {offsets = [0, 80], sizes = [8, 8], strides = [1, 1]} : vector<8x96xbf16> to vector<8x8xbf16>
    %cst_12 = arith.constant dense<0.000000e+00> : vector<8x8xf32>
    %43 = tpu.matmul %40, %41, %cst_12 {dimension_numbers = #tpu.dot_dimension_numbers<[1], [1], [0], [0], [0, 0, 1, 0], [], []>} : vector<8x8xbf16>, vector<8x8xbf16>, vector<8x8xf32> -> vector<8x8xf32>
    %44 = vector.broadcast %3 : vector<1x8xf32> to vector<8x8xf32>
    %45 = arith.addf %43, %44 : vector<8x8xf32>
    %cst_13 = arith.constant dense<0xFF800000> : vector<8xf32>
    %46 = vector.multi_reduction <maximumf>, %45, %cst_13 [1] : vector<8x8xf32> to vector<8xf32>
    %47 = vector.shape_cast %46 : vector<8xf32> to vector<8x1xf32>
    %48 = vector.broadcast %47 : vector<8x1xf32> to vector<8x8xf32>
    %49 = arith.subf %45, %48 : vector<8x8xf32>
    %50 = math.exp %49 : vector<8x8xf32>
    %cst_14 = arith.constant dense<0.000000e+00> : vector<8xf32>
    %51 = vector.multi_reduction <add>, %50, %cst_14 [1] : vector<8x8xf32> to vector<8xf32>
    %52 = vector.shape_cast %51 : vector<8xf32> to vector<8x1xf32>
    %53 = tpu.reciprocal %52 {approx = true} : vector<8x1xf32> -> vector<8x1xf32>
    %54 = vector.broadcast %53 : vector<8x1xf32> to vector<8x8xf32>
    %55 = arith.mulf %50, %54 : vector<8x8xf32>
    %56 = arith.truncf %55 : vector<8x8xf32> to vector<8x8xbf16>
    %cst_15 = arith.constant dense<0.000000e+00> : vector<8x8xf32>
    %57 = tpu.matmul %56, %42, %cst_15 {dimension_numbers = #tpu.dot_dimension_numbers<[1], [0], [0], [1], [0, 0, 1, 1], [], []>} : vector<8x8xbf16>, vector<8x8xbf16>, vector<8x8xf32> -> vector<8x8xf32>
    %58 = vector.extract_strided_slice %1 {offsets = [0, 24], sizes = [8, 8], strides = [1, 1]} : vector<8x96xbf16> to vector<8x8xbf16>
    %59 = vector.extract_strided_slice %1 {offsets = [0, 56], sizes = [8, 8], strides = [1, 1]} : vector<8x96xbf16> to vector<8x8xbf16>
    %60 = vector.extract_strided_slice %1 {offsets = [0, 88], sizes = [8, 8], strides = [1, 1]} : vector<8x96xbf16> to vector<8x8xbf16>
    %cst_16 = arith.constant dense<0.000000e+00> : vector<8x8xf32>
    %61 = tpu.matmul %58, %59, %cst_16 {dimension_numbers = #tpu.dot_dimension_numbers<[1], [1], [0], [0], [0, 0, 1, 0], [], []>} : vector<8x8xbf16>, vector<8x8xbf16>, vector<8x8xf32> -> vector<8x8xf32>
    %62 = vector.broadcast %3 : vector<1x8xf32> to vector<8x8xf32>
    %63 = arith.addf %61, %62 : vector<8x8xf32>
    %cst_17 = arith.constant dense<0xFF800000> : vector<8xf32>
    %64 = vector.multi_reduction <maximumf>, %63, %cst_17 [1] : vector<8x8xf32> to vector<8xf32>
    %65 = vector.shape_cast %64 : vector<8xf32> to vector<8x1xf32>
    %66 = vector.broadcast %65 : vector<8x1xf32> to vector<8x8xf32>
    %67 = arith.subf %63, %66 : vector<8x8xf32>
    %68 = math.exp %67 : vector<8x8xf32>
    %cst_18 = arith.constant dense<0.000000e+00> : vector<8xf32>
    %69 = vector.multi_reduction <add>, %68, %cst_18 [1] : vector<8x8xf32> to vector<8xf32>
    %70 = vector.shape_cast %69 : vector<8xf32> to vector<8x1xf32>
    %71 = tpu.reciprocal %70 {approx = true} : vector<8x1xf32> -> vector<8x1xf32>
    %72 = vector.broadcast %71 : vector<8x1xf32> to vector<8x8xf32>
    %73 = arith.mulf %68, %72 : vector<8x8xf32>
    %74 = arith.truncf %73 : vector<8x8xf32> to vector<8x8xbf16>
    %cst_19 = arith.constant dense<0.000000e+00> : vector<8x8xf32>
    %75 = tpu.matmul %74, %60, %cst_19 {dimension_numbers = #tpu.dot_dimension_numbers<[1], [0], [0], [1], [0, 0, 1, 1], [], []>} : vector<8x8xbf16>, vector<8x8xbf16>, vector<8x8xf32> -> vector<8x8xf32>
    %76 = tpu.concatenate %21, %39, %57, %75 in 1 : vector<8x8xf32>, vector<8x8xf32>, vector<8x8xf32>, vector<8x8xf32> -> vector<8x32xf32>
    %77 = arith.truncf %76 : vector<8x32xf32> to vector<8x32xbf16>
    %c0_20 = arith.constant 0 : index
    %c0_21 = arith.constant 0 : index
    %c0_22 = arith.constant 0 : index
    %78 = vector.load %arg3[%c0_20, %c0_21, %c0_22] : memref<1x8x32xbf16, #tpu.memory_space<vmem>>, vector<1x8x32xbf16>
    %79 = vector.shape_cast %78 : vector<1x8x32xbf16> to vector<8x32xbf16>
    %80 = vector.shape_cast %77 : vector<8x32xbf16> to vector<1x8x32xbf16>
    tpu.vector_store %arg3[%c0_20, %c0_21, %c0_22], %80 {strides = array<i32>} : memref<1x8x32xbf16, #tpu.memory_space<vmem>>, vector<1x8x32xbf16>,
    return
  }
  func.func @transform_0(%arg0: i32) -> (i32, i32, i32) {
    %c0_i32 = arith.constant 0 : i32
    %c0_i32_0 = arith.constant 0 : i32
    %c0_i32_1 = arith.constant 0 : i32
    return %arg0, %c0_i32, %c0_i32_0 : i32, i32, i32
  }
  func.func @transform_1(%arg0: i32) -> (i32, i32, i32) {
    %c0_i32 = arith.constant 0 : i32
    %c0_i32_0 = arith.constant 0 : i32
    %c0_i32_1 = arith.constant 0 : i32
    return %arg0, %c0_i32, %c0_i32_0 : i32, i32, i32
  }
  func.func @transform_2(%arg0: i32) -> (i32, i32, i32) {
    %c0_i32 = arith.constant 0 : i32
    %c0_i32_0 = arith.constant 0 : i32
    %c0_i32_1 = arith.constant 0 : i32
    return %arg0, %c0_i32, %c0_i32_0 : i32, i32, i32
  }
}

module attributes {stable_mosaic.version = 11 : i64} {
  func.func @_matmul_bias_kernel(%arg0: i32, %arg1: i32, %arg2: i32, %arg3: memref<16x32xbf16, #tpu.memory_space<vmem>>, %arg4: memref<32x96xbf16, #tpu.memory_space<vmem>>, %arg5: memref<1x96xf32, #tpu.memory_space<vmem>>, %arg6: memref<16x96xbf16, #tpu.memory_space<vmem>>, %arg7: memref<16x96xf32, #tpu.memory_space<vmem>>) attributes {dimension_semantics = [#tpu.dimension_semantics<parallel>, #tpu.dimension_semantics<parallel>, #tpu.dimension_semantics<arbitrary>], iteration_bounds = array<i64: 1, 1, 1>, scalar_prefetch = 0 : i64, scratch_operands = 1 : i64, tpu.core_type = #tpu.core_type<tc>, window_params = [{transform_indices = @transform_0, window_bounds = array<i64: 16, 32>}, {transform_indices = @transform_1, window_bounds = array<i64: 32, 96>}, {transform_indices = @transform_2, window_bounds = array<i64: 1, 96>}, {transform_indices = @transform_3, window_bounds = array<i64: 16, 96>}]} {
    %c0_i32 = arith.constant 0 : i32
    %0 = arith.cmpi eq, %arg2, %c0_i32 : i32
    %1 = arith.extui %0 : i1 to i32
    %c0_i32_0 = arith.constant 0 : i32
    %2 = arith.cmpi ne, %1, %c0_i32_0 : i32
    scf.if %2 {
      %cst_10 = arith.constant 0.000000e+00 : f32
      %12 = vector.broadcast %cst_10 : f32 to vector<16x96xf32>
      %c0_11 = arith.constant 0 : index
      %c0_12 = arith.constant 0 : index
      %13 = vector.load %arg7[%c0_11, %c0_12] : memref<16x96xf32, #tpu.memory_space<vmem>>, vector<16x96xf32>
      tpu.vector_store %arg7[%c0_11, %c0_12], %12 {strides = array<i32>} : memref<16x96xf32, #tpu.memory_space<vmem>>, vector<16x96xf32>,
    } else {
    }
    %c0 = arith.constant 0 : index
    %c0_1 = arith.constant 0 : index
    %3 = vector.load %arg7[%c0, %c0_1] : memref<16x96xf32, #tpu.memory_space<vmem>>, vector<16x96xf32>
    %c0_2 = arith.constant 0 : index
    %c0_3 = arith.constant 0 : index
    %4 = vector.load %arg3[%c0_2, %c0_3] : memref<16x32xbf16, #tpu.memory_space<vmem>>, vector<16x32xbf16>
    %c0_4 = arith.constant 0 : index
    %c0_5 = arith.constant 0 : index
    %5 = vector.load %arg4[%c0_4, %c0_5] : memref<32x96xbf16, #tpu.memory_space<vmem>>, vector<32x96xbf16>
    %cst = arith.constant dense<0.000000e+00> : vector<16x96xf32>
    %6 = tpu.matmul %4, %5, %cst {dimension_numbers = #tpu.dot_dimension_numbers<[1], [0], [0], [1], [0, 0, 1, 1], [], []>} : vector<16x32xbf16>, vector<32x96xbf16>, vector<16x96xf32> -> vector<16x96xf32>
    %7 = arith.addf %3, %6 : vector<16x96xf32>
    %c0_6 = arith.constant 0 : index
    %c0_7 = arith.constant 0 : index
    %8 = vector.load %arg7[%c0_6, %c0_7] : memref<16x96xf32, #tpu.memory_space<vmem>>, vector<16x96xf32>
    tpu.vector_store %arg7[%c0_6, %c0_7], %7 {strides = array<i32>} : memref<16x96xf32, #tpu.memory_space<vmem>>, vector<16x96xf32>,
    %c0_i32_8 = arith.constant 0 : i32
    %9 = arith.cmpi eq, %arg2, %c0_i32_8 : i32
    %10 = arith.extui %9 : i1 to i32
    %c0_i32_9 = arith.constant 0 : i32
    %11 = arith.cmpi ne, %10, %c0_i32_9 : i32
    scf.if %11 {
      %c0_10 = arith.constant 0 : index
      %c0_11 = arith.constant 0 : index
      %12 = vector.load %arg7[%c0_10, %c0_11] : memref<16x96xf32, #tpu.memory_space<vmem>>, vector<16x96xf32>
      %c0_12 = arith.constant 0 : index
      %c0_13 = arith.constant 0 : index
      %13 = vector.load %arg5[%c0_12, %c0_13] : memref<1x96xf32, #tpu.memory_space<vmem>>, vector<1x96xf32>
      %14 = vector.broadcast %13 : vector<1x96xf32> to vector<16x96xf32>
      %15 = arith.addf %12, %14 : vector<16x96xf32>
      %16 = arith.truncf %15 : vector<16x96xf32> to vector<16x96xbf16>
      %c0_14 = arith.constant 0 : index
      %c0_15 = arith.constant 0 : index
      %17 = vector.load %arg6[%c0_14, %c0_15] : memref<16x96xbf16, #tpu.memory_space<vmem>>, vector<16x96xbf16>
      tpu.vector_store %arg6[%c0_14, %c0_15], %16 {strides = array<i32>} : memref<16x96xbf16, #tpu.memory_space<vmem>>, vector<16x96xbf16>,
    } else {
    }
    return
  }
  func.func @transform_0(%arg0: i32, %arg1: i32, %arg2: i32) -> (i32, i32) {
    %c0_i32 = arith.constant 0 : i32
    return %arg0, %arg2 : i32, i32
  }
  func.func @transform_1(%arg0: i32, %arg1: i32, %arg2: i32) -> (i32, i32) {
    %c0_i32 = arith.constant 0 : i32
    return %arg2, %arg1 : i32, i32
  }
  func.func @transform_2(%arg0: i32, %arg1: i32, %arg2: i32) -> (i32, i32) {
    %c0_i32 = arith.constant 0 : i32
    %c0_i32_0 = arith.constant 0 : i32
    return %c0_i32, %arg1 : i32, i32
  }
  func.func @transform_3(%arg0: i32, %arg1: i32, %arg2: i32) -> (i32, i32) {
    %c0_i32 = arith.constant 0 : i32
    return %arg0, %arg1 : i32, i32
  }
}

module attributes {stable_mosaic.version = 11 : i64} {
  func.func @_ffn_add_ln_kernel(%arg0: i32, %arg1: i32, %arg2: memref<16x32xbf16, #tpu.memory_space<vmem>>, %arg3: memref<32x64xbf16, #tpu.memory_space<vmem>>, %arg4: memref<1x64xf32, #tpu.memory_space<vmem>>, %arg5: memref<64x32xbf16, #tpu.memory_space<vmem>>, %arg6: memref<1x32xf32, #tpu.memory_space<vmem>>, %arg7: memref<1x32xf32, #tpu.memory_space<vmem>>, %arg8: memref<1x32xf32, #tpu.memory_space<vmem>>, %arg9: memref<16x32xbf16, #tpu.memory_space<vmem>>, %arg10: memref<16x32xf32, #tpu.memory_space<vmem>>) attributes {dimension_semantics = [#tpu.dimension_semantics<parallel>, #tpu.dimension_semantics<arbitrary>], iteration_bounds = array<i64: 1, 1>, scalar_prefetch = 0 : i64, scratch_operands = 1 : i64, tpu.core_type = #tpu.core_type<tc>, window_params = [{transform_indices = @transform_0, window_bounds = array<i64: 16, 32>}, {transform_indices = @transform_1, window_bounds = array<i64: 32, 64>}, {transform_indices = @transform_2, window_bounds = array<i64: 1, 64>}, {transform_indices = @transform_3, window_bounds = array<i64: 64, 32>}, {pipeline_mode = #tpu.pipeline_mode<synchronous>, transform_indices = @transform_4, window_bounds = array<i64: 1, 32>}, {pipeline_mode = #tpu.pipeline_mode<synchronous>, transform_indices = @transform_5, window_bounds = array<i64: 1, 32>}, {pipeline_mode = #tpu.pipeline_mode<synchronous>, transform_indices = @transform_6, window_bounds = array<i64: 1, 32>}, {transform_indices = @transform_7, window_bounds = array<i64: 16, 32>}]} {
    %c0_i32 = arith.constant 0 : i32
    %0 = arith.cmpi eq, %arg1, %c0_i32 : i32
    %1 = arith.extui %0 : i1 to i32
    %c0_i32_0 = arith.constant 0 : i32
    %2 = arith.cmpi ne, %1, %c0_i32_0 : i32
    scf.if %2 {
      %cst_16 = arith.constant 0.000000e+00 : f32
      %20 = vector.broadcast %cst_16 : f32 to vector<16x32xf32>
      %c0_17 = arith.constant 0 : index
      %c0_18 = arith.constant 0 : index
      %21 = vector.load %arg10[%c0_17, %c0_18] : memref<16x32xf32, #tpu.memory_space<vmem>>, vector<16x32xf32>
      tpu.vector_store %arg10[%c0_17, %c0_18], %20 {strides = array<i32>} : memref<16x32xf32, #tpu.memory_space<vmem>>, vector<16x32xf32>,
    } else {
    }
    %c0 = arith.constant 0 : index
    %c0_1 = arith.constant 0 : index
    %3 = vector.load %arg2[%c0, %c0_1] : memref<16x32xbf16, #tpu.memory_space<vmem>>, vector<16x32xbf16>
    %c0_2 = arith.constant 0 : index
    %c0_3 = arith.constant 0 : index
    %4 = vector.load %arg3[%c0_2, %c0_3] : memref<32x64xbf16, #tpu.memory_space<vmem>>, vector<32x64xbf16>
    %cst = arith.constant dense<0.000000e+00> : vector<16x64xf32>
    %5 = tpu.matmul %3, %4, %cst {dimension_numbers = #tpu.dot_dimension_numbers<[1], [0], [0], [1], [0, 0, 1, 1], [], []>} : vector<16x32xbf16>, vector<32x64xbf16>, vector<16x64xf32> -> vector<16x64xf32>
    %c0_4 = arith.constant 0 : index
    %c0_5 = arith.constant 0 : index
    %6 = vector.load %arg4[%c0_4, %c0_5] : memref<1x64xf32, #tpu.memory_space<vmem>>, vector<1x64xf32>
    %7 = vector.broadcast %6 : vector<1x64xf32> to vector<16x64xf32>
    %8 = arith.addf %5, %7 : vector<16x64xf32>
    %cst_6 = arith.constant 0.000000e+00 : f32
    %9 = vector.broadcast %cst_6 : f32 to vector<16x64xf32>
    %10 = arith.maximumf %8, %9 : vector<16x64xf32>
    %c0_7 = arith.constant 0 : index
    %c0_8 = arith.constant 0 : index
    %11 = vector.load %arg10[%c0_7, %c0_8] : memref<16x32xf32, #tpu.memory_space<vmem>>, vector<16x32xf32>
    %12 = arith.truncf %10 : vector<16x64xf32> to vector<16x64xbf16>
    %c0_9 = arith.constant 0 : index
    %c0_10 = arith.constant 0 : index
    %13 = vector.load %arg5[%c0_9, %c0_10] : memref<64x32xbf16, #tpu.memory_space<vmem>>, vector<64x32xbf16>
    %cst_11 = arith.constant dense<0.000000e+00> : vector<16x32xf32>
    %14 = tpu.matmul %12, %13, %cst_11 {dimension_numbers = #tpu.dot_dimension_numbers<[1], [0], [0], [1], [0, 0, 1, 1], [], []>} : vector<16x64xbf16>, vector<64x32xbf16>, vector<16x32xf32> -> vector<16x32xf32>
    %15 = arith.addf %11, %14 : vector<16x32xf32>
    %c0_12 = arith.constant 0 : index
    %c0_13 = arith.constant 0 : index
    %16 = vector.load %arg10[%c0_12, %c0_13] : memref<16x32xf32, #tpu.memory_space<vmem>>, vector<16x32xf32>
    tpu.vector_store %arg10[%c0_12, %c0_13], %15 {strides = array<i32>} : memref<16x32xf32, #tpu.memory_space<vmem>>, vector<16x32xf32>,
    %c0_i32_14 = arith.constant 0 : i32
    %17 = arith.cmpi eq, %arg1, %c0_i32_14 : i32
    %18 = arith.extui %17 : i1 to i32
    %c0_i32_15 = arith.constant 0 : i32
    %19 = arith.cmpi ne, %18, %c0_i32_15 : i32
    scf.if %19 {
      %c0_16 = arith.constant 0 : index
      %c0_17 = arith.constant 0 : index
      %20 = vector.load %arg10[%c0_16, %c0_17] : memref<16x32xf32, #tpu.memory_space<vmem>>, vector<16x32xf32>
      %c0_18 = arith.constant 0 : index
      %c0_19 = arith.constant 0 : index
      %21 = vector.load %arg6[%c0_18, %c0_19] : memref<1x32xf32, #tpu.memory_space<vmem>>, vector<1x32xf32>
      %22 = vector.broadcast %21 : vector<1x32xf32> to vector<16x32xf32>
      %23 = arith.addf %20, %22 : vector<16x32xf32>
      %c0_20 = arith.constant 0 : index
      %c0_21 = arith.constant 0 : index
      %24 = vector.load %arg2[%c0_20, %c0_21] : memref<16x32xbf16, #tpu.memory_space<vmem>>, vector<16x32xbf16>
      %25 = arith.extf %24 : vector<16x32xbf16> to vector<16x32xf32>
      %26 = arith.addf %23, %25 : vector<16x32xf32>
      %cst_22 = arith.constant dense<0.000000e+00> : vector<16xf32>
      %27 = vector.multi_reduction <add>, %26, %cst_22 [1] : vector<16x32xf32> to vector<16xf32>
      %28 = vector.shape_cast %27 : vector<16xf32> to vector<16x1xf32>
      %cst_23 = arith.constant 3.200000e+01 : f32
      %29 = vector.broadcast %cst_23 : f32 to vector<16x1xf32>
      %30 = arith.divf %28, %29 : vector<16x1xf32>
      %31 = vector.broadcast %30 : vector<16x1xf32> to vector<16x32xf32>
      %32 = arith.subf %26, %31 : vector<16x32xf32>
      %33 = arith.mulf %32, %32 : vector<16x32xf32>
      %cst_24 = arith.constant dense<0.000000e+00> : vector<16xf32>
      %34 = vector.multi_reduction <add>, %33, %cst_24 [1] : vector<16x32xf32> to vector<16xf32>
      %35 = vector.shape_cast %34 : vector<16xf32> to vector<16x1xf32>
      %cst_25 = arith.constant 3.200000e+01 : f32
      %36 = vector.broadcast %cst_25 : f32 to vector<16x1xf32>
      %37 = arith.divf %35, %36 : vector<16x1xf32>
      %38 = vector.broadcast %30 : vector<16x1xf32> to vector<16x32xf32>
      %39 = arith.subf %26, %38 : vector<16x32xf32>
      %cst_26 = arith.constant 9.99999996E-13 : f32
      %40 = vector.broadcast %cst_26 : f32 to vector<16x1xf32>
      %41 = arith.addf %37, %40 : vector<16x1xf32>
      %42 = math.rsqrt %41 : vector<16x1xf32>
      %43 = vector.broadcast %42 : vector<16x1xf32> to vector<16x32xf32>
      %44 = arith.mulf %39, %43 : vector<16x32xf32>
      %c0_27 = arith.constant 0 : index
      %c0_28 = arith.constant 0 : index
      %45 = vector.load %arg7[%c0_27, %c0_28] : memref<1x32xf32, #tpu.memory_space<vmem>>, vector<1x32xf32>
      %46 = vector.broadcast %45 : vector<1x32xf32> to vector<16x32xf32>
      %47 = arith.mulf %44, %46 : vector<16x32xf32>
      %c0_29 = arith.constant 0 : index
      %c0_30 = arith.constant 0 : index
      %48 = vector.load %arg8[%c0_29, %c0_30] : memref<1x32xf32, #tpu.memory_space<vmem>>, vector<1x32xf32>
      %49 = vector.broadcast %48 : vector<1x32xf32> to vector<16x32xf32>
      %50 = arith.addf %47, %49 : vector<16x32xf32>
      %51 = arith.truncf %50 : vector<16x32xf32> to vector<16x32xbf16>
      %c0_31 = arith.constant 0 : index
      %c0_32 = arith.constant 0 : index
      %52 = vector.load %arg9[%c0_31, %c0_32] : memref<16x32xbf16, #tpu.memory_space<vmem>>, vector<16x32xbf16>
      tpu.vector_store %arg9[%c0_31, %c0_32], %51 {strides = array<i32>} : memref<16x32xbf16, #tpu.memory_space<vmem>>, vector<16x32xbf16>,
    } else {
    }
    return
  }
  func.func @transform_0(%arg0: i32, %arg1: i32) -> (i32, i32) {
    %c0_i32 = arith.constant 0 : i32
    %c0_i32_0 = arith.constant 0 : i32
    return %arg0, %c0_i32 : i32, i32
  }
  func.func @transform_1(%arg0: i32, %arg1: i32) -> (i32, i32) {
    %c0_i32 = arith.constant 0 : i32
    %c0_i32_0 = arith.constant 0 : i32
    return %c0_i32, %arg1 : i32, i32
  }
  func.func @transform_2(%arg0: i32, %arg1: i32) -> (i32, i32) {
    %c0_i32 = arith.constant 0 : i32
    %c0_i32_0 = arith.constant 0 : i32
    return %c0_i32, %arg1 : i32, i32
  }
  func.func @transform_3(%arg0: i32, %arg1: i32) -> (i32, i32) {
    %c0_i32 = arith.constant 0 : i32
    %c0_i32_0 = arith.constant 0 : i32
    return %arg1, %c0_i32 : i32, i32
  }
  func.func @transform_4(%arg0: i32, %arg1: i32) -> (i32, i32) {
    %c0_i32 = arith.constant 0 : i32
    %c0_i32_0 = arith.constant 0 : i32
    %c0_i32_1 = arith.constant 0 : i32
    return %c0_i32, %c0_i32_0 : i32, i32
  }
  func.func @transform_5(%arg0: i32, %arg1: i32) -> (i32, i32) {
    %c0_i32 = arith.constant 0 : i32
    %c0_i32_0 = arith.constant 0 : i32
    %c0_i32_1 = arith.constant 0 : i32
    return %c0_i32, %c0_i32_0 : i32, i32
  }
  func.func @transform_6(%arg0: i32, %arg1: i32) -> (i32, i32) {
    %c0_i32 = arith.constant 0 : i32
    %c0_i32_0 = arith.constant 0 : i32
    %c0_i32_1 = arith.constant 0 : i32
    return %c0_i32, %c0_i32_0 : i32, i32
  }
  func.func @transform_7(%arg0: i32, %arg1: i32) -> (i32, i32) {
    %c0_i32 = arith.constant 0 : i32
    %c0_i32_0 = arith.constant 0 : i32
    return %arg0, %c0_i32 : i32, i32
  }
}

</mosaic_0001>

<bundles_post_ra>
// kernel: encoder_forward.9
= control target key start
LH: loop header
LB: loop body
LE: loop exit
PB: predicated region body
PF: predicated region fallthrough
CT: control target
= control target key end

     0   :  { %s561_s9 = smov 0   ;;  %s630_s0 = inlined_call_operand.vmem [shape: bf16[2,8,96], index: 0, kind: input, shape index: {}]   ;;  %s631_s1 = inlined_call_operand.vmem [shape: f32[2,1,8], index: 1, kind: input, shape index: {}]   ;;  %s632_s2 = inlined_call_operand.vmem [shape: bf16[2,8,32], index: 2, kind: output, shape index: {}]  }
   0x1 LB: > { %s468_s10 = sadd.s32 4294967295, %s530_s9   ;;  %p472_p0 = scmp.ge.s32.totalorder %s530_s9, 1  ;;  %s530_s9 = sphi %s561_s9, %s12_s9  }
   0x2   : > { %p119_p1 = scmp.lt.s32.totalorder %s530_s9, 3 }
   0x4   : > { %p120_p2 = pnand %p472_p0, %p119_p1 }
   0x5   : > { %p142_p3 = scmp.lt.s32.totalorder (!%p120_p2), %s468_s10, 1  ;;  %s532_s18 = smov (!%p120_p2), 96  }
   0x6   : > { %123 = sbr.rel (%p120_p2) target bundleno = 1197 (0x4ad), region = 28  ;;  %s533_s19 = smov (!%p120_p2), 88  }
   0x7   : > { %s534_s20 = smov (!%p120_p2), 120   ;;  %s535_s21 = smov (!%p120_p2), 64  }
   0x8   : > { %s536_s22 = smov (!%p120_p2), 80   ;;  %s537_s23 = smov (!%p120_p2), 72  }
   0x9   : > { %s538_s24 = smov (!%p120_p2), 112   ;;  %s539_s25 = smov (!%p120_p2), 104  }
   0xa   : > { %s540_s26 = smov (!%p120_p2), 56   ;;  %s541_s27 = smov (!%p120_p2), 40  }
   0xb   : > { %s634_s10 = smov (!%p142_p3, %s468_s10), 1  ;;  %vm164_vm0 = vcmask 64512   ;;  %vm201_vm1 = vcmask 1043456   ;;  %s542_s28 = smov 48   ;;  %vm399_vm2 = vcmask 130048   ;;  %vm401_vm3 = vcmask 195584  }
   0xc   : > { %s473_s11 = sshll.u32 %s634_s10, 2  ;;  %s148_s17 = scalar_lea.vmem %s631_s1, %s634_s10  ;;  %vm404_vm4 = vcmask 257024  }
   0xd   : > { %s145_s14 = scalar_lea.vmem %s630_s0, %s473_s11  ;;  %v507_v8 = vld [vmem:[%s148_s17] ss:$0 sm:$0xff]  ;;  %s543_s29 = smov 8  }
   0xe   : > { %v154_v0 = vld [vmem:[%s145_s14] sm:$0xf]  ;;  %s544_s30 = smov 16   ;;  %s545_s3 = smov 24  }
   0xf   : > { %v160_v1 = vunpack.c.l.b16 %v154_v0  ;;  %s152_s6 = scalar_lea.vmem %s632_s2, %s473_s11 }
  0x11   : > { %v581_v2 = vpack.c.b16 %v160_v1, %v160_v1 }
  0x13   : > { %162 = vrot.lane.b32.xlu0 %v581_v2, %s532_s18  ;;  %220 = vrot.lane.b32.xlu1 %v581_v2, %s533_s19 }
  0x14   : > { %218 = vrot.lane.b32.xlu2 %v581_v2, %s534_s20 }
  0x1c   : > { %196 = vrot.lane.b32.xlu2 %v581_v2, %s535_s21 }
  0x24   : > { %276 = vrot.lane.b32.xlu2 %v581_v2, %s536_s22 }
  0x2c   : > { %332 = vrot.lane.b32.xlu2 %v581_v2, %s537_s23 }
  0x34   : > { %274 = vrot.lane.b32.xlu2 %v581_v2, %s538_s24 }
  0x3c   : > { %330 = vrot.lane.b32.xlu2 %v581_v2, %s539_s25 }
  0x6e   : > { %v219_v7 = vpop.permute.xlu2 %218 }
  0x76   : > { %v197_v13 = vpop.permute.xlu2 %196 }
  0x77   : > { %v203_v18 = vsel %vm201_vm1, %v197_v13, 0 }
  0x78   : > { %212 = vmatpush.bf16.msra.mxu1 %v203_v18 }
  0x7e   : > { %v277_v14 = vpop.permute.xlu2 %276 }
  0x7f   : > { %v282_v16 = vsel %vm164_vm0, %v277_v14, 0 }
  0x80   : > { %291 = vmatpush.bf16.xpose.msrb.mxu1 %v282_v16 }
  0x85   : > { %v163_v3 = vpop.permute.xlu0 %162  ;;  %v221_v5 = vpop.permute.xlu1 %220 }
  0x86   : > { %v169_v4 = vsel %vm164_vm0, %v163_v3, 0  ;;  %v226_v6 = vsel %vm164_vm0, %v221_v5, 0  ;;  %v333_v15 = vpop.permute.xlu2 %332 }
  0x87   : > { %178 = vmatpush.bf16.xpose.msra.mxu0 %v169_v4  ;;  %235 = vmatpush.bf16.xpose.msra.mxu2 %v226_v6  ;;  %v338_v17 = vsel %vm164_vm0, %v333_v15, 0 }
  0x8e   : > { %475 = vmatmul.msk.bf16.vlgmr.msra.gmra.mxu0 %vm164_vm0, %v154_v0  ;;  %477 = vmatmul.msk.bf16.vlgmr.msra.gmra.mxu2 %vm164_vm0, %v219_v7  ;;  %v275_v19 = vpop.permute.xlu2 %274 }
  0x8f   : > { %347 = vmatpush.bf16.xpose.msrb.mxu0 %v338_v17 }
  0x96   : > { %v331_v20 = vpop.permute.xlu2 %330 }
  0x9e   : > { %481 = vmatmul.msk.bf16.vlgmr.msrb.gmra.mxu0 %vm164_vm0, %v331_v20 }
 0x10b   : > { %v180_v9 = vpop.f32.mrf.mxu0 }
 0x10c   : > { %v181_v10 = vadd.f32 %v507_v8, %v180_v9 }
 0x10e   : > { %v184_v11 = vsel %vm164_vm0, %v181_v10, -inf }
 0x10f   : > { %185 = vmax.xlane.f32.xlu0 %v184_v11 }
 0x111   : > { %v237_v21 = vpop.f32.mrf.mxu2 }
 0x112   : > { %v238_v22 = vadd.f32 %v507_v8, %v237_v21 }
 0x113   : > { %v182_v12 = vpop.f32.mrf.mxu0 }
 0x114   : > { %v241_v24 = vsel %vm164_vm0, %v238_v22, -inf }
 0x115   : > { %242 = vmax.xlane.f32.xlu2 %v241_v24 }
 0x119   : > { %v239_v27 = vpop.f32.mrf.mxu2 }
 0x11b   : > { %v349_v30 = vpop.f32.mrf.mxu0 }
 0x11c   : > { %v350_v31 = vadd.f32 %v507_v8, %v349_v30 }
 0x11e   : > { %v353_v32 = vsel %vm164_vm0, %v350_v31, -inf }
 0x123   : > { %v351_v34 = vpop.f32.mrf.mxu0 }
 0x182   : > { %v186_v23 = vpop.xlane.xlu0 %185 }
 0x183   : > { %v187_v25 = vsub.f32 %v181_v10, %v186_v23 }
 0x185   : > { %v188_v26 = vmul.f32 1.442695, %v187_v25 }
 0x187   : > { %508 = vpow2.f32 %v188_v26 }
 0x188   : > { %v243_v39 = vpop.xlane.xlu2 %242 }
 0x189   : > { %v244_v41 = vsub.f32 %v238_v22, %v243_v39 }
 0x18b   : > { %v245_v42 = vmul.f32 1.442695, %v244_v41 }
 0x18d   : > { %v509_v28 = vpop.eup %508 }
 0x18e   : > { %v190_v29 = vsel %vm164_vm0, %v509_v28, 0.0 }
 0x18f   : > { %191 = vadd.xlane.f32.xlu1 %v190_v29 }
 0x197   : > { %354 = vmax.xlane.f32.xlu1 %v353_v32 }
 0x1b0   : > { %253 = vrot.lane.b32.xlu1 %v581_v2, %s540_s26 }
 0x1b8   : > { %365 = vrot.lane.b32.xlu1 %v581_v2, %s541_s27 }
 0x202   : > { %v192_v33 = vpop.xlane.xlu1 %191 }
 0x203   : > { %510 = vrcp.f32 %v192_v33 }
 0x204   : > { %512 = vpow2.f32 %v245_v42 }
 0x209   : > { %v511_v35 = vpop.eup %510 }
 0x20a   : > { %v194_v36 = vmul.f32 %v511_v35, %v509_v28  ;;  %v355_v43 = vpop.xlane.xlu1 %354  ;;  %v513_v49 = vpop.eup %512 }
 0x20b   : > { %v356_v46 = vsub.f32 %v350_v31, %v355_v43  ;;  %v247_v51 = vsel %vm164_vm0, %v513_v49, 0.0 }
 0x20c   : > { %v195_v37 = vpack.c.bf16 %v194_v36, %v194_v36 }
 0x20d   : > { %v357_v48 = vmul.f32 1.442695, %v356_v46 }
 0x20e   : > { %476 = vmatmul.msk.bf16.vlgmr.msra.gmra.mxu1 %vm164_vm0, %v195_v37 }
 0x20f   : > { %514 = vpow2.f32 %v357_v48 }
 0x215   : > { %v515_v52 = vpop.eup %514 }
 0x216   : > { %v359_v53 = vsel %vm164_vm0, %v515_v52, 0.0 }
 0x21e   : > { %479 = vmatmul.msk.bf16.vlgmr.msrb.gmra.mxu1 %vm164_vm0, %v275_v19 }
 0x222   : > { %v254_v54 = vpop.permute.xlu1 %253 }
 0x223   : > { %v259_v55 = vsel %vm201_vm1, %v254_v54, 0 }
 0x224   : > { %268 = vmatpush.bf16.msra.mxu3 %v259_v55 }
 0x22a   : > { %v366_v56 = vpop.permute.xlu1 %365 }
 0x22b   : > { %v371_v57 = vsel %vm201_vm1, %v366_v56, 0 }
 0x22c   : > { %380 = vmatpush.bf16.msrb.mxu2 %v371_v57 }
 0x28b   : > { %v607_v38 = vpop.f32.mrf.mxu1 }
 0x293   : > { %v216_v40 = vpop.f32.mrf.mxu1 }
 0x29b   : > { %v293_v44 = vpop.f32.mrf.mxu1 }
 0x29c   : > { %v294_v45 = vadd.f32 %v507_v8, %v293_v44 }
 0x29e   : > { %v297_v47 = vsel %vm164_vm0, %v294_v45, -inf }
 0x29f   : > { %298 = vmax.xlane.f32.xlu0 %v297_v47 }
 0x2a3   : > { %v295_v50 = vpop.f32.mrf.mxu1 }
 0x2a7   : > { %248 = vadd.xlane.f32.xlu0 %v247_v51 }
 0x2af   : > { %360 = vadd.xlane.f32.xlu0 %v359_v53 }
 0x312   : > { %v299_v58 = vpop.xlane.xlu0 %298 }
 0x313   : > { %v300_v59 = vsub.f32 %v294_v45, %v299_v58 }
 0x315   : > { %v301_v60 = vmul.f32 1.442695, %v300_v59 }
 0x317   : > { %516 = vpow2.f32 %v301_v60 }
 0x31a   : > { %v249_v61 = vpop.xlane.xlu0 %248 }
 0x31b   : > { %518 = vrcp.f32 %v249_v61 }
 0x31d   : > { %v517_v62 = vpop.eup %516 }
 0x31e   : > { %v303_v63 = vsel %vm164_vm0, %v517_v62, 0.0 }
 0x31f   : > { %304 = vadd.xlane.f32.xlu0 %v303_v63 }
 0x321   : > { %v519_v0 = vpop.eup %518 }
 0x322   : > { %v361_v1 = vpop.xlane.xlu0 %360  ;;  %v251_v3 = vmul.f32 %v519_v0, %v513_v49 }
 0x323   : > { %520 = vrcp.f32 %v361_v1 }
 0x324   : > { %v252_v4 = vpack.c.bf16 %v251_v3, %v251_v3 }
 0x326   : > { %478 = vmatmul.msk.bf16.vlgmr.msra.gmra.mxu3 %vm164_vm0, %v252_v4 }
 0x329   : > { %v521_v5 = vpop.eup %520 }
 0x32a   : > { %v363_v6 = vmul.f32 %v521_v5, %v515_v52 }
 0x32c   : > { %v364_v7 = vpack.c.bf16 %v363_v6, %v363_v6 }
 0x32e   : > { %482 = vmatmul.msk.bf16.vlgmr.msrb.gmra.mxu2 %vm164_vm0, %v364_v7 }
 0x333   : > { %309 = vrot.lane.b32.xlu0 %v581_v2, %s542_s28 }
 0x392   : > { %v305_v8 = vpop.xlane.xlu0 %304 }
 0x393   : > { %522 = vrcp.f32 %v305_v8 }
 0x399   : > { %v523_v9 = vpop.eup %522 }
 0x39a   : > { %v307_v10 = vmul.f32 %v523_v9, %v517_v62 }
 0x39c   : > { %v308_v13 = vpack.c.bf16 %v307_v10, %v307_v10 }
 0x3a5   : > { %v310_v11 = vpop.permute.xlu0 %309 }
 0x3a6   : > { %v315_v12 = vsel %vm201_vm1, %v310_v11, 0 }
 0x3a7   : > { %324 = vmatpush.bf16.msrb.mxu3 %v315_v12 }
 0x3a9   : > { %v270_v14 = vpop.f32.mrf.mxu3 }
 0x3aa   : > { %480 = vmatmul.msk.bf16.vlgmr.msrb.gmra.mxu3 %vm164_vm0, %v308_v13  ;;  %387 = vrot.lane.b32.xlu2 %v270_v14, %s543_s29 }
 0x3b1   : > { %v272_v15 = vpop.f32.mrf.mxu3  ;;  %v382_v16 = vpop.f32.mrf.mxu2 }
 0x3b9   : > { %v384_v17 = vpop.f32.mrf.mxu2 }
 0x404   : > { %v388_v20 = vpop.permute.xlu2 %387 }
 0x405   : > { %v398_v21 = vsel %vm164_vm0, %v607_v38, %v388_v20 }
 0x42d   : > { %v326_v18 = vpop.f32.mrf.mxu3 }
 0x42e   : > { %391 = vrot.lane.b32.xlu1 %v326_v18, %s544_s30 }
 0x435   : > { %v328_v2 = vpop.f32.mrf.mxu3 }
 0x436   : > { %395 = vrot.lane.b32.xlu1 %v382_v16, %s545_s3 }
 0x4a0   : > { %v392_v19 = vpop.permute.xlu1 %391 }
 0x4a1   : > { %v400_v22 = vsel %vm399_vm2, %v398_v21, %v392_v19 }
 0x4a8   : > { %v396_v23 = vpop.permute.xlu1 %395 }
 0x4a9   : > { %v402_v24 = vsel %vm401_vm3, %v400_v22, %v396_v23 }
 0x4aa   : > { %v403_v25 = vpack.c.bf16 %v402_v24, %v402_v24 }
 0x4ac   : > { %405 = vst.msk [vmem:[%s152_s6] sm:$0xf] %vm404_vm4, %v403_v25 }
 0x4ad PF: > { %s12_s9 = sadd.s32 1, %s530_s9  }
 0x4ae   : > { %p9_p4 = scmp.ge.s32.totalorder %s12_s9, 4  }
 0x4b0   :  { %11 = sbr.rel (!%p9_p4) target bundleno = 1 (0x1), region = 61 }

// kernel: encoder_forward.10
= control target key start
LH: loop header
LB: loop body
LE: loop exit
PB: predicated region body
PF: predicated region fallthrough
CT: control target
= control target key end

     0   :  { %vm28_vm0 = vcmask 261120   ;;  %v198_v1 = vmov 0.0   ;;  %v199_v22 = vmov 32.0   ;;  %vm160_vm6 = vcmask 257024   ;;  %s271_s2 = inlined_call_operand.vmem [shape: bf16[32,32], index: 2, kind: input, shape index: {}]   ;;  %s272_s0 = inlined_call_operand.vmem [shape: bf16[16,32], index: 0, kind: input, shape index: {}]   ;;  %s273_s3 = inlined_call_operand.vmem [shape: f32[1,32], index: 3, kind: input, shape index: {}]   ;;  %s274_s1 = inlined_call_operand.vmem [shape: bf16[16,32], index: 1, kind: input, shape index: {}]   ;;  %s275_s4 = inlined_call_operand.vmem [shape: f32[1,32], index: 4, kind: input, shape index: {}]   ;;  %s276_s5 = inlined_call_operand.vmem [shape: f32[1,32], index: 5, kind: input, shape index: {}]   ;;  %s277_s6 = inlined_call_operand.vmem [shape: bf16[16,32], index: 6, kind: output, shape index: {}]  }
   0x1   :  { %v182_v0 = vld [vmem:[%s271_s2 + $0x8] sm:$0xff]  ;;  %29 = vst.msk [vmem:[#allocation2] sm:$0xff] %vm28_vm0, %v198_v1  ;;  %v181_v2 = vld [vmem:[%s271_s2] sm:$0xff]  ;;  %192 = vrcp.f32 %v199_v22 }
   0x2   :  { %30 = vst.msk [vmem:[#allocation2 + $0x8] sm:$0xff] %vm28_vm0, %v198_v1  ;;  %66 = vmatpush.bf16.msra.mxu0 %v182_v0  ;;  %v180_v3 = vld [vmem:[%s272_s0] sm:$0xff] }
   0x3   :  { %v184_v8 = vld [vmem:[%s274_s1] sm:$0xff]  }
   0x4   :  { %v189_v9 = vld [vmem:[%s273_s3] ss:$0 sm:$0xff]  ;;  %v185_v12 = vunpack.c.l.bf16 %v184_v8  ;;  %v186_v17 = vunpack.c.h.bf16 %v184_v8 }
   0x5   :  { %v190_v53 = vld [vmem:[%s275_s4] ss:$0 sm:$0xff] }
   0x6   :  { %67 = vmatpush.bf16.msra.mxu0 %v181_v2  ;;  %v191_v56 = vld [vmem:[%s276_s5] ss:$0 sm:$0xff] }
   0x7   :  { %v193_v23 = vpop.eup %192 }
   0x8   :  { %v31_v4 = vld [vmem:[#allocation2] sm:$0xff]  ;;  %v102_v24 = vmul.f32 32.0, %v193_v23  ;;  %vm106_vm1 = vweird.f32 %v193_v23 }
   0x9   :  { %179 = vmatmul.msk.bf16.vlgmr.msra.gmra.mxu0 %vm28_vm0, %v180_v3  ;;  %v32_v7 = vld [vmem:[#allocation2 + $0x8] sm:$0xff] }
   0xa   :  { %v103_v25 = vsub.f32 1.0, %v102_v24 }
   0xc   :  { %v104_v26 = vmul.f32 %v193_v23, %v103_v25 }
   0xe   :  { %v105_v27 = vadd.f32 %v193_v23, %v104_v26 }
  0x10   :  { %v107_v28 = vsel %vm106_vm1, %v193_v23, %v105_v27 }
  0x86   :  { %v69_v5 = vpop.f32.mrf.mxu0 }
  0x87   :  { %v74_v6 = vadd.f32 %v69_v5, %v31_v4 }
  0x89   :  { %76 = vst.msk [vmem:[#allocation2] sm:$0xff] %vm28_vm0, %v74_v6 }
  0x8e   :  { %v71_v10 = vpop.f32.mrf.mxu0 }
  0x8f   :  { %v75_v11 = vadd.f32 %v71_v10, %v32_v7 }
  0x90   :  { %v81_v13 = vld [vmem:[#allocation2] sm:$0xff] }
  0x91   :  { %77 = vst.msk [vmem:[#allocation2 + $0x8] sm:$0xff] %vm28_vm0, %v75_v11  ;;  %v87_v14 = vadd.f32 %v189_v9, %v81_v13 }
  0x93   :  { %v93_v15 = vadd.f32 %v185_v12, %v87_v14 }
  0x95   :  { %v95_v16 = vsel %vm28_vm0, %v93_v15, 0.0 }
  0x96   :  { %96 = vadd.xlane.f32.xlu0 %v95_v16 }
  0x98   :  { %v82_v18 = vld [vmem:[#allocation2 + $0x8] sm:$0xff] }
  0x99   :  { %v88_v19 = vadd.f32 %v189_v9, %v82_v18 }
  0x9b   :  { %v94_v20 = vadd.f32 %v186_v17, %v88_v19 }
  0x9d   :  { %v98_v21 = vsel %vm28_vm0, %v94_v20, 0.0 }
  0x9e   :  { %99 = vadd.xlane.f32.xlu0 %v98_v21 }
 0x109   :  { %v97_v29 = vpop.xlane.xlu0 %96 }
 0x10a   :  { %v108_v30 = vmul.f32 %v107_v28, %v97_v29 }
 0x10c   :  { %v110_v31 = vsub.f32 %v93_v15, %v108_v30 }
 0x10e   :  { %v112_v32 = vmul.f32 %v110_v31, %v110_v31 }
 0x110   :  { %v114_v33 = vsel %vm28_vm0, %v112_v32, 0.0 }
 0x111   :  { %115 = vadd.xlane.f32.xlu1 %v114_v33  ;;  %v100_v34 = vpop.xlane.xlu0 %99 }
 0x112   :  { %v109_v35 = vmul.f32 %v107_v28, %v100_v34 }
 0x114   :  { %v111_v36 = vsub.f32 %v94_v20, %v109_v35 }
 0x116   :  { %v113_v37 = vmul.f32 %v111_v36, %v111_v36 }
 0x118   :  { %v117_v38 = vsel %vm28_vm0, %v113_v37, 0.0 }
 0x119   :  { %118 = vadd.xlane.f32.xlu1 %v117_v38 }
 0x184   :  { %v116_v39 = vpop.xlane.xlu1 %115 }
 0x185   :  { %v120_v40 = vmul.f32 %v116_v39, %v107_v28 }
 0x187   :  { %v122_v41 = vadd.f32 1e-12, %v120_v40 }
 0x189   :  { %194 = vrsqrt.f32 %v122_v41  ;;  %vm130_vm3 = vweird.f32 %v122_v41 }
 0x18c   :  { %v119_v42 = vpop.xlane.xlu1 %118 }
 0x18d   :  { %v121_v43 = vmul.f32 %v119_v42, %v107_v28 }
 0x18f   :  { %v195_v44 = vpop.eup %194  ;;  %v123_v45 = vadd.f32 1e-12, %v121_v43 }
 0x190   :  { %v125_v46 = vmul.f32 %v195_v44, %v122_v41  ;;  %vm131_vm2 = vweird.f32 %v195_v44 }
 0x191   :  { %196 = vrsqrt.f32 %v123_v45  ;;  %vm132_vm4 = vmor %vm130_vm3, %vm131_vm2  ;;  %vm140_vm7 = vweird.f32 %v123_v45 }
 0x192   :  { %v126_v47 = vmul.f32 %v195_v44, %v125_v46 }
 0x194   :  { %v127_v48 = vmul.f32 0.5, %v126_v47 }
 0x196   :  { %v128_v49 = vsub.f32 1.5, %v127_v48 }
 0x197   :  { %v197_v50 = vpop.eup %196 }
 0x198   :  { %v129_v51 = vmul.f32 %v195_v44, %v128_v49  ;;  %v135_v52 = vmul.f32 %v197_v50, %v123_v45  ;;  %vm141_vm5 = vweird.f32 %v197_v50 }
 0x199   :  { %vm142_vm8 = vmor %vm140_vm7, %vm141_vm5 }
 0x19a   :  { %v133_v54 = vsel %vm132_vm4, %v195_v44, %v129_v51  ;;  %v136_v55 = vmul.f32 %v197_v50, %v135_v52 }
 0x19b   :  { %v144_v57 = vmul.f32 %v133_v54, %v110_v31 }
 0x19c   :  { %v137_v58 = vmul.f32 0.5, %v136_v55 }
 0x19d   :  { %v150_v59 = vmul.f32 %v190_v53, %v144_v57 }
 0x19e   :  { %v138_v60 = vsub.f32 1.5, %v137_v58 }
 0x19f   :  { %v156_v61 = vadd.f32 %v191_v56, %v150_v59 }
 0x1a0   :  { %v139_v62 = vmul.f32 %v197_v50, %v138_v60 }
 0x1a1   :  { %v158_v63 = vpack.c.bf16 %v156_v61, %v156_v61 }
 0x1a2   :  { %v143_v0 = vsel %vm142_vm8, %v197_v50, %v139_v62 }
 0x1a3   :  { %161 = vst.msk [vmem:[%s277_s6] sm:$0xf] %vm160_vm6, %v158_v63  ;;  %v145_v1 = vmul.f32 %v143_v0, %v111_v36 }
 0x1a5   :  { %v151_v2 = vmul.f32 %v190_v53, %v145_v1 }
 0x1a7   :  { %v157_v3 = vadd.f32 %v191_v56, %v151_v2 }
 0x1a9   :  { %v159_v4 = vpack.c.bf16 %v157_v3, %v157_v3 }
 0x1ab   :  { %162 = vst.msk [vmem:[%s277_s6 + $0x4] sm:$0xf] %vm160_vm6, %v159_v4 }

// kernel: encoder_forward.8
= control target key start
LH: loop header
LB: loop body
LE: loop exit
PB: predicated region body
PF: predicated region fallthrough
CT: control target
= control target key end

     0   :  { %vm19_vm0 = vcmask 785408   ;;  %v108_v1 = vmov 0.0   ;;  %vm47_vm1 = vcmask 261120   ;;  %vm83_vm2 = vcmask 781312   ;;  %s151_s1 = inlined_call_operand.vmem [shape: bf16[32,96], index: 1, kind: input, shape index: {}]   ;;  %s152_s2 = inlined_call_operand.vmem [shape: f32[1,96], index: 2, kind: input, shape index: {}]   ;;  %s153_s0 = inlined_call_operand.vmem [shape: bf16[16,32], index: 0, kind: input, shape index: {}]   ;;  %s154_s3 = inlined_call_operand.vmem [shape: bf16[16,96], index: 3, kind: output, shape index: {}]  }
   0x1   :  { %v105_v0 = vld [vmem:[%s151_s1 + $0x8] sm:$0xff]  ;;  %20 = vst.msk [vmem:[#allocation2] sm:$0xff] %vm19_vm0, %v108_v1  ;;  %v104_v2 = vld [vmem:[%s151_s1] sm:$0xff] }
   0x2   :  { %21 = vst.msk [vmem:[#allocation2 + $0x8] sm:$0xff] %vm19_vm0, %v108_v1  ;;  %57 = vmatpush.bf16.msra.mxu0 %v105_v0  ;;  %v103_v3 = vld [vmem:[%s153_s0] sm:$0xff] }
   0x3   :  { %v107_v8 = vld [vmem:[%s152_s2] ss:$0 sm:$0xff] }
   0x6   :  { %58 = vmatpush.bf16.msra.mxu0 %v104_v2 }
   0x8   :  { %v22_v4 = vld [vmem:[#allocation2] sm:$0xff] }
   0x9   :  { %102 = vmatmul.msk.bf16.vlgmr.msra.gmra.mxu0 %vm47_vm1, %v103_v3  ;;  %v23_v7 = vld [vmem:[#allocation2 + $0x8] sm:$0xff] }
  0x86   :  { %v60_v5 = vpop.f32.mrf.mxu0 }
  0x87   :  { %v65_v6 = vadd.f32 %v60_v5, %v22_v4 }
  0x89   :  { %68 = vst.msk [vmem:[#allocation2] sm:$0xff] %vm19_vm0, %v65_v6 }
  0x8e   :  { %v62_v9 = vpop.f32.mrf.mxu0 }
  0x8f   :  { %v66_v10 = vadd.f32 %v62_v9, %v23_v7 }
  0x90   :  { %v73_v11 = vld [vmem:[#allocation2] sm:$0xff] }
  0x91   :  { %v79_v12 = vadd.f32 %v107_v8, %v73_v11  ;;  %69 = vst.msk [vmem:[#allocation2 + $0x8] sm:$0xff] %vm19_vm0, %v66_v10 }
  0x93   :  { %v81_v13 = vpack.c.bf16 %v79_v12, %v79_v12 }
  0x95   :  { %84 = vst.msk [vmem:[%s154_s3] sm:$0xf] %vm83_vm2, %v81_v13 }
  0x98   :  { %v74_v14 = vld [vmem:[#allocation2 + $0x8] sm:$0xff] }
  0x99   :  { %v80_v15 = vadd.f32 %v107_v8, %v74_v14 }
  0x9b   :  { %v82_v16 = vpack.c.bf16 %v80_v15, %v80_v15 }
  0x9d   :  { %85 = vst.msk [vmem:[%s154_s3 + $0x4] sm:$0xf] %vm83_vm2, %v82_v16 }

// kernel: encoder_forward.11
= control target key start
LH: loop header
LB: loop body
LE: loop exit
PB: predicated region body
PF: predicated region fallthrough
CT: control target
= control target key end

     0   :  { %vm31_vm0 = vcmask 261120   ;;  %v280_v7 = vmov 0.0   ;;  %vm116_vm1 = vcmask 523264   ;;  %v281_v34 = vmov 32.0   ;;  %s373_s1 = inlined_call_operand.vmem [shape: bf16[32,64], index: 1, kind: input, shape index: {}]   ;;  %s374_s2 = inlined_call_operand.vmem [shape: f32[1,64], index: 2, kind: input, shape index: {}]   ;;  %s375_s0 = inlined_call_operand.vmem [shape: bf16[16,32], index: 0, kind: input, shape index: {}]   ;;  %s376_s3 = inlined_call_operand.vmem [shape: bf16[64,32], index: 3, kind: input, shape index: {}]   ;;  %s377_s4 = inlined_call_operand.vmem [shape: f32[1,32], index: 4, kind: input, shape index: {}]   ;;  %s378_s5 = inlined_call_operand.vmem [shape: f32[1,32], index: 5, kind: input, shape index: {}]   ;;  %s379_s6 = inlined_call_operand.vmem [shape: f32[1,32], index: 6, kind: input, shape index: {}]   ;;  %s380_s7 = inlined_call_operand.vmem [shape: bf16[16,32], index: 7, kind: output, shape index: {}]  }
   0x1   :  { %v259_v0 = vld [vmem:[%s373_s1 + $0x8] sm:$0xff]  ;;  %v258_v1 = vld [vmem:[%s373_s1] sm:$0xff]  ;;  %v263_v3 = vld [vmem:[%s376_s3 + $0x18] sm:$0xff]  ;;  %32 = vst.msk [vmem:[#allocation2] sm:$0xff] %vm31_vm0, %v280_v7  ;;  %274 = vrcp.f32 %v281_v34  ;;  %vm220_vm7 = vcmask 257024  }
   0x2   :  { %71 = vmatpush.bf16.msra.mxu0 %v259_v0  ;;  %v257_v2 = vld [vmem:[%s375_s0] sm:$0xff]  ;;  %124 = vmatpush.bf16.msra.mxu1 %v263_v3  ;;  %v262_v4 = vld [vmem:[%s376_s3 + $0x10] sm:$0xff]  ;;  %v261_v5 = vld [vmem:[%s376_s3 + $0x8] sm:$0xff]  ;;  %33 = vst.msk [vmem:[#allocation2 + $0x8] sm:$0xff] %vm31_vm0, %v280_v7 }
   0x3   :  { %v260_v6 = vld [vmem:[%s376_s3] sm:$0xff] }
   0x4   :  { %v270_v9 = vld [vmem:[%s374_s2] ss:$0 sm:$0xff] }
   0x5   :  { %v265_v20 = vld [vmem:[%s375_s0] sm:$0xff]  }
   0x6   :  { %72 = vmatpush.bf16.msra.mxu0 %v258_v1  ;;  %125 = vmatpush.bf16.msra.mxu1 %v262_v4  ;;  %v271_v21 = vld [vmem:[%s377_s4] ss:$0 sm:$0xff]  ;;  %v266_v24 = vunpack.c.l.bf16 %v265_v20  ;;  %v267_v29 = vunpack.c.h.bf16 %v265_v20 }
   0x7   :  { %v275_v35 = vpop.eup %274  ;;  %v272_v1 = vld [vmem:[%s378_s5] ss:$0 sm:$0xff] }
   0x8   :  { %v81_v16 = vld [vmem:[#allocation2] sm:$0xff]  ;;  %v162_v36 = vmul.f32 32.0, %v275_v35  ;;  %vm166_vm2 = vweird.f32 %v275_v35 }
   0x9   :  { %239 = vmatmul.msk.bf16.vlgmr.msra.gmra.mxu0 %vm31_vm0, %v257_v2  ;;  %v82_v19 = vld [vmem:[#allocation2 + $0x8] sm:$0xff]  ;;  %v273_v4 = vld [vmem:[%s379_s6] ss:$0 sm:$0xff] }
   0xa   :  { %126 = vmatpush.bf16.msra.mxu1 %v261_v5  ;;  %v163_v37 = vsub.f32 1.0, %v162_v36 }
   0xc   :  { %v164_v38 = vmul.f32 %v275_v35, %v163_v37 }
   0xe   :  { %127 = vmatpush.bf16.msra.mxu1 %v260_v6  ;;  %v165_v39 = vadd.f32 %v275_v35, %v164_v38 }
  0x10   :  { %v167_v40 = vsel %vm166_vm2, %v275_v35, %v165_v39 }
  0x86   :  { %v74_v8 = vpop.f32.mrf.mxu0 }
  0x87   :  { %v75_v10 = vadd.f32 %v270_v9, %v74_v8 }
  0x89   :  { %v79_v13 = vmax.f32 %v75_v10, 0.0 }
  0x8e   :  { %v76_v11 = vpop.f32.mrf.mxu0 }
  0x8f   :  { %v77_v12 = vadd.f32 %v270_v9, %v76_v11 }
  0x91   :  { %v80_v14 = vmax.f32 %v77_v12, 0.0 }
  0x93   :  { %v83_v15 = vpack.c.bf16 %v80_v14, %v79_v13 }
  0x95   :  { %256 = vmatmul.msk.bf16.vlgmr.msra.gmra.mxu1 %vm116_vm1, %v83_v15 }
 0x112   :  { %v129_v17 = vpop.f32.mrf.mxu1 }
 0x113   :  { %v134_v18 = vadd.f32 %v129_v17, %v81_v16 }
 0x115   :  { %136 = vst.msk [vmem:[#allocation2] sm:$0xff] %vm31_vm0, %v134_v18 }
 0x11a   :  { %v131_v22 = vpop.f32.mrf.mxu1 }
 0x11b   :  { %v135_v23 = vadd.f32 %v131_v22, %v82_v19 }
 0x11c   :  { %v141_v25 = vld [vmem:[#allocation2] sm:$0xff] }
 0x11d   :  { %137 = vst.msk [vmem:[#allocation2 + $0x8] sm:$0xff] %vm31_vm0, %v135_v23  ;;  %v147_v26 = vadd.f32 %v271_v21, %v141_v25 }
 0x11f   :  { %v153_v27 = vadd.f32 %v266_v24, %v147_v26 }
 0x121   :  { %v155_v28 = vsel %vm31_vm0, %v153_v27, 0.0 }
 0x122   :  { %156 = vadd.xlane.f32.xlu0 %v155_v28 }
 0x124   :  { %v142_v30 = vld [vmem:[#allocation2 + $0x8] sm:$0xff] }
 0x125   :  { %v148_v31 = vadd.f32 %v271_v21, %v142_v30 }
 0x127   :  { %v154_v32 = vadd.f32 %v267_v29, %v148_v31 }
 0x129   :  { %v158_v33 = vsel %vm31_vm0, %v154_v32, 0.0 }
 0x12a   :  { %159 = vadd.xlane.f32.xlu0 %v158_v33 }
 0x195   :  { %v157_v41 = vpop.xlane.xlu0 %156 }
 0x196   :  { %v168_v42 = vmul.f32 %v167_v40, %v157_v41 }
 0x198   :  { %v170_v43 = vsub.f32 %v153_v27, %v168_v42 }
 0x19a   :  { %v172_v44 = vmul.f32 %v170_v43, %v170_v43 }
 0x19c   :  { %v174_v45 = vsel %vm31_vm0, %v172_v44, 0.0 }
 0x19d   :  { %175 = vadd.xlane.f32.xlu1 %v174_v45  ;;  %v160_v46 = vpop.xlane.xlu0 %159 }
 0x19e   :  { %v169_v47 = vmul.f32 %v167_v40, %v160_v46 }
 0x1a0   :  { %v171_v48 = vsub.f32 %v154_v32, %v169_v47 }
 0x1a2   :  { %v173_v49 = vmul.f32 %v171_v48, %v171_v48 }
 0x1a4   :  { %v177_v50 = vsel %vm31_vm0, %v173_v49, 0.0 }
 0x1a5   :  { %178 = vadd.xlane.f32.xlu1 %v177_v50 }
 0x210   :  { %v176_v51 = vpop.xlane.xlu1 %175 }
 0x211   :  { %v180_v52 = vmul.f32 %v176_v51, %v167_v40 }
 0x213   :  { %v182_v53 = vadd.f32 1e-12, %v180_v52 }
 0x215   :  { %276 = vrsqrt.f32 %v182_v53  ;;  %vm190_vm4 = vweird.f32 %v182_v53 }
 0x218   :  { %v179_v54 = vpop.xlane.xlu1 %178 }
 0x219   :  { %v181_v55 = vmul.f32 %v179_v54, %v167_v40 }
 0x21b   :  { %v277_v56 = vpop.eup %276  ;;  %v183_v57 = vadd.f32 1e-12, %v181_v55 }
 0x21c   :  { %v185_v58 = vmul.f32 %v277_v56, %v182_v53  ;;  %vm191_vm3 = vweird.f32 %v277_v56 }
 0x21d   :  { %278 = vrsqrt.f32 %v183_v57  ;;  %vm192_vm5 = vmor %vm190_vm4, %vm191_vm3  ;;  %vm200_vm8 = vweird.f32 %v183_v57 }
 0x21e   :  { %v186_v59 = vmul.f32 %v277_v56, %v185_v58 }
 0x220   :  { %v187_v60 = vmul.f32 0.5, %v186_v59 }
 0x222   :  { %v188_v61 = vsub.f32 1.5, %v187_v60 }
 0x223   :  { %v279_v62 = vpop.eup %278 }
 0x224   :  { %v189_v63 = vmul.f32 %v277_v56, %v188_v61  ;;  %v195_v0 = vmul.f32 %v279_v62, %v183_v57  ;;  %vm201_vm6 = vweird.f32 %v279_v62 }
 0x225   :  { %vm202_vm9 = vmor %vm200_vm8, %vm201_vm6 }
 0x226   :  { %v193_v2 = vsel %vm192_vm5, %v277_v56, %v189_v63  ;;  %v196_v3 = vmul.f32 %v279_v62, %v195_v0 }
 0x227   :  { %v204_v5 = vmul.f32 %v193_v2, %v170_v43 }
 0x228   :  { %v197_v6 = vmul.f32 0.5, %v196_v3 }
 0x229   :  { %v210_v7 = vmul.f32 %v272_v1, %v204_v5 }
 0x22a   :  { %v198_v8 = vsub.f32 1.5, %v197_v6 }
 0x22b   :  { %v216_v9 = vadd.f32 %v273_v4, %v210_v7 }
 0x22c   :  { %v199_v10 = vmul.f32 %v279_v62, %v198_v8 }
 0x22d   :  { %v218_v11 = vpack.c.bf16 %v216_v9, %v216_v9 }
 0x22e   :  { %v203_v12 = vsel %vm202_vm9, %v279_v62, %v199_v10 }
 0x22f   :  { %221 = vst.msk [vmem:[%s380_s7] sm:$0xf] %vm220_vm7, %v218_v11  ;;  %v205_v13 = vmul.f32 %v203_v12, %v171_v48 }
 0x231   :  { %v211_v14 = vmul.f32 %v272_v1, %v205_v13 }
 0x233   :  { %v217_v15 = vadd.f32 %v273_v4, %v211_v14 }
 0x235   :  { %v219_v16 = vpack.c.bf16 %v217_v15, %v217_v15 }
 0x237   :  { %222 = vst.msk [vmem:[%s380_s7 + $0x4] sm:$0xf] %vm220_vm7, %v219_v16 }

</bundles_post_ra>
